<compile_context>
chip_gen: v7x
topology: tpu7x:2x2x1
jax: 0.10.0
libtpu: 0.0.40
codegen_flags: <defaults>
</compile_context>

<pallas_src>
from functools import partial

import jax
import jax.numpy as jnp
from jax.experimental import pallas as pl
from jax.experimental.pallas import tpu as pltpu


def _feat_pos_fused_kernel(x_ref, w_ref, b_ref, feat_ref, pos_ref, *, feat_dim, pos_dim):
    # One fused MXU matmul: (tb, F) @ (F, 128) -> (tb, 128) with f32
    # accumulation, bias add, then two direct stores (feat lane-dense, pos a
    # cheap masked store) — no padded output slab ever reaches HBM.
    acc = (
        jnp.dot(x_ref[...], w_ref[...], preferred_element_type=jnp.float32)
        + b_ref[...]
    )
    feat_ref[...] = acc[:, :feat_dim].astype(feat_ref.dtype)
    pos_ref[...] = acc[:, feat_dim:feat_dim + pos_dim].astype(pos_ref.dtype)


def prepare_feature_positional_params(w_feat, b_feat, w_pos, b_pos, *, dtype=jnp.float32):
    """One-time parameter prep (call at init, not per forward).

    w_feat: (feat_dim, F), w_pos: (pos_dim, F) -- PyTorch Linear convention.
    `dtype` should match the dtype you will feed x in (use jnp.bfloat16 for a
    bf16 pipeline: halves HBM bytes and uses the native bf16 MXU path).
    Returns (w_fused (F, n_pad), b_fused (1, n_pad), feat_dim, pos_dim).
    """
    feat_dim, F = w_feat.shape
    pos_dim, F2 = w_pos.shape
    assert F == F2, "both Linears must share num_features"

    n_out = feat_dim + pos_dim
    n_pad = ((n_out + 127) // 128) * 128  # lane-dense MXU width (pad cols are discarded in-kernel)

    w = jnp.concatenate([jnp.asarray(w_feat).T, jnp.asarray(w_pos).T], axis=1)  # (F, n_out)
    b = jnp.concatenate([jnp.asarray(b_feat), jnp.asarray(b_pos)], axis=0)      # (n_out,)
    w = jnp.pad(w, ((0, 0), (0, n_pad - n_out))).astype(dtype)
    b = jnp.pad(b, (0, n_pad - n_out)).reshape(1, n_pad).astype(dtype)
    return w, b, feat_dim, pos_dim


def _round_up(v, m):
    return ((v + m - 1) // m) * m


def _tpu_cores_per_chip():
    """Best-effort TensorCore count per chip (2 on v7x, 1 on v5e/v6e).

    Falls back to 1 (never force a grid split) if it cannot be determined,
    which is exactly the desired behaviour on single-TC chips.
    """
    try:
        info = pltpu.get_tpu_info()
        for attr in ("num_cores", "core_count", "num_tensorcores", "tensorcore_count"):
            n = getattr(info, attr, None)
            if isinstance(n, int) and n > 0:
                return n
    except Exception:
        pass
    return 1


def _pick_batch_tile(B, tile_b, num_cores):
    """Rows per grid step.

    - Single tile whenever B fits (no forced split on 1-TC v5e/v6e; the grid is
      a serial loop there and splitting only adds ~0.35us/step + smaller DMAs).
    - On multi-TC chips, round the tile count up to a multiple of the core
      count so the "parallel" batch axis splits evenly across TensorCores.
    - Tile rows are a multiple of 8 (sublane); ragged tails are masked by
      Pallas, never padded in the wrapper.
    """
    if B <= tile_b:
        return _round_up(B, 8), 1
    tb = _round_up(min(tile_b, B), 8)
    n_tiles = pl.cdiv(B, tb)
    if num_cores > 1 and n_tiles % num_cores != 0:
        n_tiles = _round_up(n_tiles, num_cores)
        tb = _round_up(pl.cdiv(B, n_tiles), 8)
        n_tiles = pl.cdiv(B, tb)
    return tb, n_tiles


def feature_positional_encoder(x, params, *, tile_b=2048, min_pallas_rows=2048, use_pallas=None):
    """x: (B, num_features). params: output of prepare_feature_positional_params.

    Returns (feature_embedding (B, feat_dim), positional_embedding (B, pos_dim)).
    """
    w_fused, b_fused, feat_dim, pos_dim = params
    B, F = x.shape
    n_pad = w_fused.shape[1]
    n_out = feat_dim + pos_dim

    # Keep x and the pre-prepared weights in the same dtype so the dot runs on
    # the MXU's native path (prefer preparing params in x's dtype up front).
    if x.dtype != w_fused.dtype:
        x = x.astype(w_fused.dtype)

    if use_pallas is None:
        use_pallas = B >= min_pallas_rows
    if not use_pallas:
        # Small-batch fast path: launch/grid overhead of a custom call dominates
        # ~100s of KiB of traffic; XLA's fused GEMM is at parity or better and
        # the slices below fuse into downstream consumers.
        y = (
            jnp.dot(x, w_fused[:, :n_out], preferred_element_type=jnp.float32)
            + b_fused[0, :n_out]
        ).astype(x.dtype)
        return y[:, :feat_dim], y[:, feat_dim:n_out]

    tb, n_tiles = _pick_batch_tile(B, tile_b, _tpu_cores_per_chip())

    kernel = partial(_feat_pos_fused_kernel, feat_dim=feat_dim, pos_dim=pos_dim)

    feat, pos = pl.pallas_call(
        kernel,
        out_shape=(
            jax.ShapeDtypeStruct((B, feat_dim), x.dtype),
            jax.ShapeDtypeStruct((B, pos_dim), x.dtype),
        ),
        grid_spec=pltpu.PrefetchScalarGridSpec(
            num_scalar_prefetch=0,
            grid=(n_tiles,),
            in_specs=[
                pl.BlockSpec((tb, F), lambda i: (i, 0)),       # x batch tile (ragged tail over-read)
                pl.BlockSpec((F, n_pad), lambda i: (0, 0)),    # fused weights (constant block, DMA'd once)
                pl.BlockSpec((1, n_pad), lambda i: (0, 0)),    # fused bias    (constant block, DMA'd once)
            ],
            out_specs=[
                pl.BlockSpec((tb, feat_dim), lambda i: (i, 0)),  # feat: lane-dense store
                pl.BlockSpec((tb, pos_dim), lambda i: (i, 0)),   # pos: masked store, vst slot has slack
            ],
        ),
        compiler_params=pltpu.CompilerParams(
            dimension_semantics=("parallel",),
        ),
    )(x, w_fused, b_fused)
    return feat, pos


if __name__ == "__main__":
    # Small shapes consistent with the module.
    batch = 256
    num_features = 32
    feature_embedding_dim = 64
    pos_embedding_dim = 48

    key = jax.random.PRNGKey(0)
    kx, kwf, kbf, kwp, kbp = jax.random.split(key, 5)

    x = jax.random.normal(kx, (batch, num_features), dtype=jnp.float32)

    # Deterministic parameter init (PyTorch Linear convention: W is (out, in)).
    bound = 1.0 / jnp.sqrt(num_features)
    w_feat = jax.random.uniform(kwf, (feature_embedding_dim, num_features),
                                minval=-bound, maxval=bound, dtype=jnp.float32)
    b_feat = jax.random.uniform(kbf, (feature_embedding_dim,),
                                minval=-bound, maxval=bound, dtype=jnp.float32)
    w_pos = jax.random.uniform(kwp, (pos_embedding_dim, num_features),
                               minval=-bound, maxval=bound, dtype=jnp.float32)
    b_pos = jax.random.uniform(kbp, (pos_embedding_dim,),
                               minval=-bound, maxval=bound, dtype=jnp.float32)

    # One-time prep (transpose/concat/pad hoisted out of the hot path).
    params = prepare_feature_positional_params(w_feat, b_feat, w_pos, b_pos)

    # Reference (plain JAX mirrors torch Linear: y = x @ W.T + b).
    feat_ref = x @ w_feat.T + b_feat
    pos_ref = x @ w_pos.T + b_pos

    # 1) Pallas path (forced on; default dispatch would pick the XLA fast path
    #    for a batch this small).
    feat, pos = feature_positional_encoder(x, params, use_pallas=True)
    jax.block_until_ready((feat, pos))
    assert feat.shape == (batch, feature_embedding_dim)
    assert pos.shape == (batch, pos_embedding_dim)
    assert jnp.allclose(feat, feat_ref, atol=1e-5, rtol=1e-5)
    assert jnp.allclose(pos, pos_ref, atol=1e-5, rtol=1e-5)

    # 2) Ragged batch (no wrapper padding; Pallas masks the tail block).
    f2, p2 = feature_positional_encoder(x[:199], params, use_pallas=True)
    jax.block_until_ready((f2, p2))
    assert jnp.allclose(f2, feat_ref[:199], atol=1e-5, rtol=1e-5)
    assert jnp.allclose(p2, pos_ref[:199], atol=1e-5, rtol=1e-5)

    # 3) Multi-tile grid (exercise the batch-tiled / parallel-axis path).
    f3, p3 = feature_positional_encoder(x, params, tile_b=64, use_pallas=True)
    jax.block_until_ready((f3, p3))
    assert jnp.allclose(f3, feat_ref, atol=1e-5, rtol=1e-5)
    assert jnp.allclose(p3, pos_ref, atol=1e-5, rtol=1e-5)

    # 4) Default dispatch (small batch -> XLA fused GEMM fast path).
    f4, p4 = feature_positional_encoder(x, params)
    jax.block_until_ready((f4, p4))
    assert jnp.allclose(f4, feat_ref, atol=1e-5, rtol=1e-5)
    assert jnp.allclose(p4, pos_ref, atol=1e-5, rtol=1e-5)

    # 5) bf16 end-to-end (weights prepared in bf16 to match a bf16 x; f32 accum).
    params_bf16 = prepare_feature_positional_params(
        w_feat, b_feat, w_pos, b_pos, dtype=jnp.bfloat16)
    f5, p5 = feature_positional_encoder(x.astype(jnp.bfloat16), params_bf16, use_pallas=True)
    jax.block_until_ready((f5, p5))
    assert jnp.allclose(f5.astype(jnp.float32), feat_ref, atol=0.1, rtol=0.1)
    assert jnp.allclose(p5.astype(jnp.float32), pos_ref, atol=0.1, rtol=0.1)

    print("KERNEL_OK")
</pallas_src>

<mosaic_0001>
module attributes {stable_mosaic.version = 11 : i64} {
  func.func @_feat_pos_fused_kernel(%arg0: i32, %arg1: memref<256x32xf32, #tpu.memory_space<vmem>>, %arg2: memref<32x128xf32, #tpu.memory_space<vmem>>, %arg3: memref<1x128xf32, #tpu.memory_space<vmem>>, %arg4: memref<256x64xf32, #tpu.memory_space<vmem>>, %arg5: memref<256x48xf32, #tpu.memory_space<vmem>>) attributes {dimension_semantics = [#tpu.dimension_semantics<parallel>], iteration_bounds = array<i64: 1>, scalar_prefetch = 0 : i64, scratch_operands = 0 : i64, tpu.core_type = #tpu.core_type<tc>, window_params = [{transform_indices = @transform_0, window_bounds = array<i64: 256, 32>}, {pipeline_mode = #tpu.pipeline_mode<synchronous>, transform_indices = @transform_1, window_bounds = array<i64: 32, 128>}, {pipeline_mode = #tpu.pipeline_mode<synchronous>, transform_indices = @transform_2, window_bounds = array<i64: 1, 128>}, {transform_indices = @transform_3, window_bounds = array<i64: 256, 64>}, {transform_indices = @transform_4, window_bounds = array<i64: 256, 48>}]} {
    %c0 = arith.constant 0 : index
    %c0_0 = arith.constant 0 : index
    %0 = vector.load %arg1[%c0, %c0_0] : memref<256x32xf32, #tpu.memory_space<vmem>>, vector<256x32xf32>
    %c0_1 = arith.constant 0 : index
    %c0_2 = arith.constant 0 : index
    %1 = vector.load %arg2[%c0_1, %c0_2] : memref<32x128xf32, #tpu.memory_space<vmem>>, vector<32x128xf32>
    %cst = arith.constant dense<0.000000e+00> : vector<256x128xf32>
    %2 = tpu.matmul %0, %1, %cst {dimension_numbers = #tpu.dot_dimension_numbers<[1], [0], [0], [1], [0, 0, 1, 1], [], []>} : vector<256x32xf32>, vector<32x128xf32>, vector<256x128xf32> -> vector<256x128xf32>
    %c0_3 = arith.constant 0 : index
    %c0_4 = arith.constant 0 : index
    %3 = vector.load %arg3[%c0_3, %c0_4] : memref<1x128xf32, #tpu.memory_space<vmem>>, vector<1x128xf32>
    %4 = vector.broadcast %3 : vector<1x128xf32> to vector<256x128xf32>
    %5 = arith.addf %2, %4 : vector<256x128xf32>
    %6 = vector.extract_strided_slice %5 {offsets = [0, 0], sizes = [256, 64], strides = [1, 1]} : vector<256x128xf32> to vector<256x64xf32>
    %c0_5 = arith.constant 0 : index
    %c0_6 = arith.constant 0 : index
    %7 = vector.load %arg4[%c0_5, %c0_6] : memref<256x64xf32, #tpu.memory_space<vmem>>, vector<256x64xf32>
    tpu.vector_store %arg4[%c0_5, %c0_6], %6 {strides = array<i32>} : memref<256x64xf32, #tpu.memory_space<vmem>>, vector<256x64xf32>,
    %8 = vector.extract_strided_slice %5 {offsets = [0, 64], sizes = [256, 48], strides = [1, 1]} : vector<256x128xf32> to vector<256x48xf32>
    %c0_7 = arith.constant 0 : index
    %c0_8 = arith.constant 0 : index
    %9 = vector.load %arg5[%c0_7, %c0_8] : memref<256x48xf32, #tpu.memory_space<vmem>>, vector<256x48xf32>
    tpu.vector_store %arg5[%c0_7, %c0_8], %8 {strides = array<i32>} : memref<256x48xf32, #tpu.memory_space<vmem>>, vector<256x48xf32>,
    return
  }
  func.func @transform_0(%arg0: i32) -> (i32, i32) {
    %c0_i32 = arith.constant 0 : i32
    %c0_i32_0 = arith.constant 0 : i32
    return %arg0, %c0_i32 : i32, i32
  }
  func.func @transform_1(%arg0: i32) -> (i32, i32) {
    %c0_i32 = arith.constant 0 : i32
    %c0_i32_0 = arith.constant 0 : i32
    %c0_i32_1 = arith.constant 0 : i32
    return %c0_i32, %c0_i32_0 : i32, i32
  }
  func.func @transform_2(%arg0: i32) -> (i32, i32) {
    %c0_i32 = arith.constant 0 : i32
    %c0_i32_0 = arith.constant 0 : i32
    %c0_i32_1 = arith.constant 0 : i32
    return %c0_i32, %c0_i32_0 : i32, i32
  }
  func.func @transform_3(%arg0: i32) -> (i32, i32) {
    %c0_i32 = arith.constant 0 : i32
    %c0_i32_0 = arith.constant 0 : i32
    return %arg0, %c0_i32 : i32, i32
  }
  func.func @transform_4(%arg0: i32) -> (i32, i32) {
    %c0_i32 = arith.constant 0 : i32
    %c0_i32_0 = arith.constant 0 : i32
    return %arg0, %c0_i32 : i32, i32
  }
}

</mosaic_0001>

<bundles_post_ra>
// kernel: tpu_custom_call.1
= control target key start
LH: loop header
LB: loop body
LE: loop exit
PB: predicated region body
PF: predicated region fallthrough
CT: control target
= control target key end

     0   :  { %vm59_vm0 = vcmask 261120   ;;  %vm381_vm1 = vcmask 523264   ;;  %s721_s10 = smov 64   ;;  %vm542_vm2 = vcmask 392192   ;;  %s1212_s1 = inlined_call_operand.vmem [shape: f32[32,128], index: 1, kind: input, shape index: {}]   ;;  %s1213_s0 = inlined_call_operand.vmem [shape: f32[256,32], index: 0, kind: input, shape index: {}]   ;;  %s1214_s2 = inlined_call_operand.vmem [shape: f32[1,128], index: 2, kind: input, shape index: {}]   ;;  %s1215_s3 = inlined_call_operand.vmem [shape: f32[256,64], index: 3, kind: output, shape index: {0}]   ;;  %s1216_s4 = inlined_call_operand.vmem [shape: f32[256,48], index: 4, kind: output, shape index: {1}]  }
   0x1   :  { %v48_v0 = vld [vmem:[%s1212_s1] sm:$0xff]  ;;  %v49_v1 = vld [vmem:[%s1212_s1 + $0x8] sm:$0xff]  ;;  %v50_v2 = vld [vmem:[%s1212_s1 + $0x10] sm:$0xff] }
   0x2   :  { %v708_v3 = vpack.c.bf16 %v49_v1, %v48_v0  ;;  %v51_v4 = vld [vmem:[%s1212_s1 + $0x18] sm:$0xff]  ;;  %v16_v5 = vld [vmem:[%s1213_s0] sm:$0xff]  ;;  %v17_v8 = vld [vmem:[%s1213_s0 + $0x8] sm:$0xff] }
   0x3   :  { %v32_v6 = vld [vmem:[%s1213_s0 + $0x80] sm:$0xff]  ;;  %v712_v7 = vpack.c.bf16 %v51_v4, %v50_v2  ;;  %660 = vmatprep.mubr.msk.f32.mxu0 %vm59_vm0, %v16_v5  ;;  %v33_v9 = vld [vmem:[%s1213_s0 + $0x88] sm:$0xff]  ;;  %v18_v10 = vld [vmem:[%s1213_s0 + $0x10] sm:$0xff] }
   0x4   :  { %684 = vmatprep.mubr.msk.f32.mxu1 %vm59_vm0, %v32_v6  ;;  %709 = vmatprep.subr.bf16.mxu0 %v708_v3  ;;  %v34_v11 = vld [vmem:[%s1213_s0 + $0x90] sm:$0xff]  ;;  %v19_v12 = vld [vmem:[%s1213_s0 + $0x18] sm:$0xff]  ;;  %v20_v14 = vld [vmem:[%s1213_s0 + $0x20] sm:$0xff] }
   0x5   :  { %716 = vmatprep.subr.bf16.mxu1 %v708_v3  ;;  %711 = vmatpush3.bf16.msra.mxu0 %v708_v3  ;;  %v35_v13 = vld [vmem:[%s1213_s0 + $0x98] sm:$0xff]  ;;  %v36_v15 = vld [vmem:[%s1213_s0 + $0xa0] sm:$0xff]  ;;  %v21_v16 = vld [vmem:[%s1213_s0 + $0x28] sm:$0xff] }
   0x6   :  { %718 = vmatpush3.bf16.msra.mxu1 %v708_v3  ;;  %713 = vmatprep.subr.bf16.mxu0 %v712_v7  ;;  %v37_v17 = vld [vmem:[%s1213_s0 + $0xa8] sm:$0xff]  ;;  %v22_v18 = vld [vmem:[%s1213_s0 + $0x30] sm:$0xff]  ;;  %v23_v20 = vld [vmem:[%s1213_s0 + $0x38] sm:$0xff] }
   0x7   :  { %717 = vmatprep.subr.bf16.mxu1 %v712_v7  ;;  %v38_v19 = vld [vmem:[%s1213_s0 + $0xb0] sm:$0xff]  ;;  %v39_v21 = vld [vmem:[%s1213_s0 + $0xb8] sm:$0xff]  ;;  %v24_v22 = vld [vmem:[%s1213_s0 + $0x40] sm:$0xff] }
   0x8   :  { %v40_v23 = vld [vmem:[%s1213_s0 + $0xc0] sm:$0xff]  ;;  %v25_v24 = vld [vmem:[%s1213_s0 + $0x48] sm:$0xff]  ;;  %v26_v26 = vld [vmem:[%s1213_s0 + $0x50] sm:$0xff] }
   0x9   :  { %715 = vmatpush3.bf16.msra.mxu0 %v712_v7  ;;  %v41_v25 = vld [vmem:[%s1213_s0 + $0xc8] sm:$0xff]  ;;  %v42_v27 = vld [vmem:[%s1213_s0 + $0xd0] sm:$0xff]  ;;  %v27_v28 = vld [vmem:[%s1213_s0 + $0x58] sm:$0xff] }
   0xa   :  { %719 = vmatpush3.bf16.msra.mxu1 %v712_v7  ;;  %v43_v29 = vld [vmem:[%s1213_s0 + $0xd8] sm:$0xff]  ;;  %v28_v30 = vld [vmem:[%s1213_s0 + $0x60] sm:$0xff]  ;;  %v29_v32 = vld [vmem:[%s1213_s0 + $0x68] sm:$0xff] }
   0xb   :  { %v44_v31 = vld [vmem:[%s1213_s0 + $0xe0] sm:$0xff]  ;;  %v45_v33 = vld [vmem:[%s1213_s0 + $0xe8] sm:$0xff]  ;;  %v30_v34 = vld [vmem:[%s1213_s0 + $0x70] sm:$0xff] }
   0xc   :  { %661 = vmatmul.mubr.msk.f32.vlgmr.msra.gmra.mrb[0].mxu0 %vm59_vm0, %v17_v8  ;;  %v46_v35 = vld [vmem:[%s1213_s0 + $0xf0] sm:$0xff]  ;;  %v31_v36 = vld [vmem:[%s1213_s0 + $0x78] sm:$0xff]  ;;  %v890_v38 = vld [vmem:[%s1214_s2] ss:$0 sm:$0xff] }
   0xd   :  { %685 = vmatmul.mubr.msk.f32.vlgmr.msra.gmra.mrb[0].mxu1 %vm59_vm0, %v33_v9  ;;  %663 = vmatprep.mubr.msk.f32.mxu0 %vm59_vm0, %v18_v10  ;;  %v47_v37 = vld [vmem:[%s1213_s0 + $0xf8] sm:$0xff] }
   0xe   :  { %687 = vmatprep.mubr.msk.f32.mxu1 %vm59_vm0, %v34_v11 }
  0x10   :  { %664 = vmatmul.mubr.msk.f32.gmra.mrb[2].mxu0 %vm59_vm0, %v19_v12 }
  0x11   :  { %688 = vmatmul.mubr.msk.f32.gmra.mrb[2].mxu1 %vm59_vm0, %v35_v13  ;;  %666 = vmatprep.mubr.msk.f32.mxu0 %vm59_vm0, %v20_v14 }
  0x12   :  { %690 = vmatprep.mubr.msk.f32.mxu1 %vm59_vm0, %v36_v15 }
  0x14   :  { %667 = vmatmul.mubr.msk.f32.gmra.mrb[4].mxu0 %vm59_vm0, %v21_v16 }
  0x15   :  { %691 = vmatmul.mubr.msk.f32.gmra.mrb[4].mxu1 %vm59_vm0, %v37_v17  ;;  %669 = vmatprep.mubr.msk.f32.mxu0 %vm59_vm0, %v22_v18 }
  0x16   :  { %693 = vmatprep.mubr.msk.f32.mxu1 %vm59_vm0, %v38_v19 }
  0x18   :  { %670 = vmatmul.mubr.msk.f32.gmra.mrb[6].mxu0 %vm59_vm0, %v23_v20 }
  0x19   :  { %694 = vmatmul.mubr.msk.f32.gmra.mrb[6].mxu1 %vm59_vm0, %v39_v21  ;;  %672 = vmatprep.mubr.msk.f32.mxu0 %vm59_vm0, %v24_v22 }
  0x1a   :  { %696 = vmatprep.mubr.msk.f32.mxu1 %vm59_vm0, %v40_v23 }
  0x1c   :  { %673 = vmatmul.mubr.msk.f32.gmra.mrb[8].mxu0 %vm59_vm0, %v25_v24 }
  0x1d   :  { %697 = vmatmul.mubr.msk.f32.gmra.mrb[8].mxu1 %vm59_vm0, %v41_v25  ;;  %675 = vmatprep.mubr.msk.f32.mxu0 %vm59_vm0, %v26_v26 }
  0x1e   :  { %699 = vmatprep.mubr.msk.f32.mxu1 %vm59_vm0, %v42_v27 }
  0x20   :  { %676 = vmatmul.mubr.msk.f32.gmra.mrb[10].mxu0 %vm59_vm0, %v27_v28 }
  0x21   :  { %700 = vmatmul.mubr.msk.f32.gmra.mrb[10].mxu1 %vm59_vm0, %v43_v29  ;;  %678 = vmatprep.mubr.msk.f32.mxu0 %vm59_vm0, %v28_v30 }
  0x22   :  { %702 = vmatprep.mubr.msk.f32.mxu1 %vm59_vm0, %v44_v31 }
  0x24   :  { %679 = vmatmul.mubr.msk.f32.gmra.mrb[12].mxu0 %vm59_vm0, %v29_v32 }
  0x25   :  { %703 = vmatmul.mubr.msk.f32.gmra.mrb[12].mxu1 %vm59_vm0, %v45_v33  ;;  %681 = vmatprep.mubr.msk.f32.mxu0 %vm59_vm0, %v30_v34 }
  0x26   :  { %705 = vmatprep.mubr.msk.f32.mxu1 %vm59_vm0, %v46_v35 }
  0x28   :  { %682 = vmatmul.mubr.msk.f32.gmra.mrb[14].mxu0 %vm59_vm0, %v31_v36 }
  0x29   :  { %706 = vmatmul.mubr.msk.f32.gmra.mrb[14].mxu1 %vm59_vm0, %v47_v37 }
  0xdf   :  { %v662_v39 = vpop.f32.mrb[0].mxu0 }
  0xe0   :  { %v686_v40 = vpop.f32.mrb[0].mxu1  ;;  %v228_v41 = vadd.f32 %v662_v39, %v890_v38  ;;  %v222_v43 = vpop.f32.mrb[1].mxu0 }
  0xe1   :  { %v308_v42 = vadd.f32 %v686_v40, %v890_v38  ;;  %v302_v44 = vpop.f32.mrb[1].mxu1  ;;  %v223_v45 = vadd.f32 %v890_v38, %v222_v43 }
  0xe2   :  { %v303_v46 = vadd.f32 %v890_v38, %v302_v44  ;;  %383 = vst.msk [vmem:[%s1215_s3 + $0x8] sm:$0xff] %vm381_vm1, %v228_v41  ;;  %448 = vrot.lane.b32.xlu0 %v228_v41, %s721_s10 }
  0xe3   :  { %399 = vst.msk [vmem:[%s1215_s3 + $0x88] sm:$0xff] %vm381_vm1, %v308_v42  ;;  %480 = vrot.lane.b32.xlu1 %v308_v42, %s721_s10  ;;  %382 = vst.msk [vmem:[%s1215_s3] sm:$0xff] %vm381_vm1, %v223_v45  ;;  %v665_v47 = vpop.f32.mrb[2].mxu0 }
  0xe4   :  { %398 = vst.msk [vmem:[%s1215_s3 + $0x80] sm:$0xff] %vm381_vm1, %v303_v46  ;;  %v689_v48 = vpop.f32.mrb[2].mxu1  ;;  %v238_v49 = vadd.f32 %v665_v47, %v890_v38  ;;  %v232_v50 = vpop.f32.mrb[3].mxu0 }
  0xe5   :  { %v318_v51 = vadd.f32 %v689_v48, %v890_v38  ;;  %v312_v52 = vpop.f32.mrb[3].mxu1  ;;  %v233_v53 = vadd.f32 %v890_v38, %v232_v50 }
  0xe6   :  { %v313_v54 = vadd.f32 %v890_v38, %v312_v52  ;;  %385 = vst.msk [vmem:[%s1215_s3 + $0x18] sm:$0xff] %vm381_vm1, %v238_v49  ;;  %446 = vrot.lane.b32.xlu0 %v223_v45, %s721_s10 }
  0xe7   :  { %401 = vst.msk [vmem:[%s1215_s3 + $0x98] sm:$0xff] %vm381_vm1, %v318_v51  ;;  %452 = vrot.lane.b32.xlu1 %v238_v49, %s721_s10  ;;  %384 = vst.msk [vmem:[%s1215_s3 + $0x10] sm:$0xff] %vm381_vm1, %v233_v53  ;;  %v668_v55 = vpop.f32.mrb[4].mxu0 }
  0xe8   :  { %400 = vst.msk [vmem:[%s1215_s3 + $0x90] sm:$0xff] %vm381_vm1, %v313_v54  ;;  %v692_v56 = vpop.f32.mrb[4].mxu1  ;;  %v248_v57 = vadd.f32 %v668_v55, %v890_v38  ;;  %v242_v58 = vpop.f32.mrb[5].mxu0 }
  0xe9   :  { %v328_v59 = vadd.f32 %v692_v56, %v890_v38  ;;  %v322_v60 = vpop.f32.mrb[5].mxu1  ;;  %v243_v61 = vadd.f32 %v890_v38, %v242_v58 }
  0xea   :  { %v323_v62 = vadd.f32 %v890_v38, %v322_v60  ;;  %478 = vrot.lane.b32.xlu0 %v303_v46, %s721_s10  ;;  %387 = vst.msk [vmem:[%s1215_s3 + $0x28] sm:$0xff] %vm381_vm1, %v248_v57 }
  0xeb   :  { %484 = vrot.lane.b32.xlu1 %v318_v51, %s721_s10  ;;  %403 = vst.msk [vmem:[%s1215_s3 + $0xa8] sm:$0xff] %vm381_vm1, %v328_v59  ;;  %386 = vst.msk [vmem:[%s1215_s3 + $0x20] sm:$0xff] %vm381_vm1, %v243_v61  ;;  %v671_v63 = vpop.f32.mrb[6].mxu0 }
  0xec   :  { %402 = vst.msk [vmem:[%s1215_s3 + $0xa0] sm:$0xff] %vm381_vm1, %v323_v62  ;;  %v695_v0 = vpop.f32.mrb[6].mxu1  ;;  %v258_v1 = vadd.f32 %v671_v63, %v890_v38  ;;  %v252_v2 = vpop.f32.mrb[7].mxu0 }
  0xed   :  { %v338_v3 = vadd.f32 %v695_v0, %v890_v38  ;;  %v332_v4 = vpop.f32.mrb[7].mxu1  ;;  %v253_v5 = vadd.f32 %v890_v38, %v252_v2 }
  0xee   :  { %v333_v6 = vadd.f32 %v890_v38, %v332_v4  ;;  %482 = vrot.lane.b32.xlu0 %v313_v54, %s721_s10  ;;  %389 = vst.msk [vmem:[%s1215_s3 + $0x38] sm:$0xff] %vm381_vm1, %v258_v1 }
  0xef   :  { %450 = vrot.lane.b32.xlu1 %v233_v53, %s721_s10  ;;  %405 = vst.msk [vmem:[%s1215_s3 + $0xb8] sm:$0xff] %vm381_vm1, %v338_v3  ;;  %388 = vst.msk [vmem:[%s1215_s3 + $0x30] sm:$0xff] %vm381_vm1, %v253_v5  ;;  %v674_v7 = vpop.f32.mrb[8].mxu0 }
  0xf0   :  { %404 = vst.msk [vmem:[%s1215_s3 + $0xb0] sm:$0xff] %vm381_vm1, %v333_v6  ;;  %v698_v8 = vpop.f32.mrb[8].mxu1  ;;  %v268_v9 = vadd.f32 %v674_v7, %v890_v38  ;;  %v262_v10 = vpop.f32.mrb[9].mxu0 }
  0xf1   :  { %v348_v11 = vadd.f32 %v698_v8, %v890_v38  ;;  %v342_v12 = vpop.f32.mrb[9].mxu1  ;;  %v263_v13 = vadd.f32 %v890_v38, %v262_v10 }
  0xf2   :  { %v343_v14 = vadd.f32 %v890_v38, %v342_v12  ;;  %454 = vrot.lane.b32.xlu0 %v243_v61, %s721_s10  ;;  %391 = vst.msk [vmem:[%s1215_s3 + $0x48] sm:$0xff] %vm381_vm1, %v268_v9 }
  0xf3   :  { %456 = vrot.lane.b32.xlu1 %v248_v57, %s721_s10  ;;  %407 = vst.msk [vmem:[%s1215_s3 + $0xc8] sm:$0xff] %vm381_vm1, %v348_v11  ;;  %390 = vst.msk [vmem:[%s1215_s3 + $0x40] sm:$0xff] %vm381_vm1, %v263_v13  ;;  %v677_v15 = vpop.f32.mrb[10].mxu0 }
  0xf4   :  { %406 = vst.msk [vmem:[%s1215_s3 + $0xc0] sm:$0xff] %vm381_vm1, %v343_v14  ;;  %v701_v16 = vpop.f32.mrb[10].mxu1  ;;  %v278_v17 = vadd.f32 %v677_v15, %v890_v38  ;;  %v272_v18 = vpop.f32.mrb[11].mxu0 }
  0xf5   :  { %v358_v19 = vadd.f32 %v701_v16, %v890_v38  ;;  %v352_v20 = vpop.f32.mrb[11].mxu1  ;;  %v273_v21 = vadd.f32 %v890_v38, %v272_v18 }
  0xf6   :  { %v353_v22 = vadd.f32 %v890_v38, %v352_v20  ;;  %486 = vrot.lane.b32.xlu0 %v323_v62, %s721_s10  ;;  %393 = vst.msk [vmem:[%s1215_s3 + $0x58] sm:$0xff] %vm381_vm1, %v278_v17 }
  0xf7   :  { %488 = vrot.lane.b32.xlu1 %v328_v59, %s721_s10  ;;  %409 = vst.msk [vmem:[%s1215_s3 + $0xd8] sm:$0xff] %vm381_vm1, %v358_v19  ;;  %392 = vst.msk [vmem:[%s1215_s3 + $0x50] sm:$0xff] %vm381_vm1, %v273_v21  ;;  %v680_v23 = vpop.f32.mrb[12].mxu0 }
  0xf8   :  { %408 = vst.msk [vmem:[%s1215_s3 + $0xd0] sm:$0xff] %vm381_vm1, %v353_v22  ;;  %v704_v24 = vpop.f32.mrb[12].mxu1  ;;  %v288_v25 = vadd.f32 %v680_v23, %v890_v38  ;;  %v282_v26 = vpop.f32.mrb[13].mxu0 }
  0xf9   :  { %v368_v27 = vadd.f32 %v704_v24, %v890_v38  ;;  %v362_v28 = vpop.f32.mrb[13].mxu1  ;;  %v283_v29 = vadd.f32 %v890_v38, %v282_v26 }
  0xfa   :  { %v363_v30 = vadd.f32 %v890_v38, %v362_v28  ;;  %458 = vrot.lane.b32.xlu0 %v253_v5, %s721_s10  ;;  %395 = vst.msk [vmem:[%s1215_s3 + $0x68] sm:$0xff] %vm381_vm1, %v288_v25 }
  0xfb   :  { %460 = vrot.lane.b32.xlu1 %v258_v1, %s721_s10  ;;  %411 = vst.msk [vmem:[%s1215_s3 + $0xe8] sm:$0xff] %vm381_vm1, %v368_v27  ;;  %394 = vst.msk [vmem:[%s1215_s3 + $0x60] sm:$0xff] %vm381_vm1, %v283_v29  ;;  %v683_v31 = vpop.f32.mrb[14].mxu0 }
  0xfc   :  { %410 = vst.msk [vmem:[%s1215_s3 + $0xe0] sm:$0xff] %vm381_vm1, %v363_v30  ;;  %v707_v32 = vpop.f32.mrb[14].mxu1  ;;  %v298_v33 = vadd.f32 %v683_v31, %v890_v38  ;;  %v292_v34 = vpop.f32.mrb[15].mxu0 }
  0xfd   :  { %v378_v35 = vadd.f32 %v707_v32, %v890_v38  ;;  %v372_v36 = vpop.f32.mrb[15].mxu1  ;;  %v293_v37 = vadd.f32 %v890_v38, %v292_v34 }
  0xfe   :  { %v373_v39 = vadd.f32 %v890_v38, %v372_v36  ;;  %490 = vrot.lane.b32.xlu0 %v333_v6, %s721_s10  ;;  %397 = vst.msk [vmem:[%s1215_s3 + $0x78] sm:$0xff] %vm381_vm1, %v298_v33 }
  0xff   :  { %492 = vrot.lane.b32.xlu1 %v338_v3, %s721_s10  ;;  %413 = vst.msk [vmem:[%s1215_s3 + $0xf8] sm:$0xff] %vm381_vm1, %v378_v35  ;;  %396 = vst.msk [vmem:[%s1215_s3 + $0x70] sm:$0xff] %vm381_vm1, %v293_v37 }
 0x100   :  { %412 = vst.msk [vmem:[%s1215_s3 + $0xf0] sm:$0xff] %vm381_vm1, %v373_v39 }
 0x102   :  { %462 = vrot.lane.b32.xlu0 %v263_v13, %s721_s10 }
 0x103   :  { %464 = vrot.lane.b32.xlu1 %v268_v9, %s721_s10 }
 0x106   :  { %494 = vrot.lane.b32.xlu0 %v343_v14, %s721_s10 }
 0x107   :  { %496 = vrot.lane.b32.xlu1 %v348_v11, %s721_s10 }
 0x10a   :  { %466 = vrot.lane.b32.xlu0 %v273_v21, %s721_s10 }
 0x10b   :  { %468 = vrot.lane.b32.xlu1 %v278_v17, %s721_s10 }
 0x10e   :  { %498 = vrot.lane.b32.xlu0 %v353_v22, %s721_s10 }
 0x10f   :  { %500 = vrot.lane.b32.xlu1 %v358_v19, %s721_s10 }
 0x112   :  { %470 = vrot.lane.b32.xlu0 %v283_v29, %s721_s10 }
 0x113   :  { %472 = vrot.lane.b32.xlu1 %v288_v25, %s721_s10 }
 0x116   :  { %502 = vrot.lane.b32.xlu0 %v363_v30, %s721_s10 }
 0x117   :  { %504 = vrot.lane.b32.xlu1 %v368_v27, %s721_s10 }
 0x11a   :  { %474 = vrot.lane.b32.xlu0 %v293_v37, %s721_s10 }
 0x11b   :  { %476 = vrot.lane.b32.xlu1 %v298_v33, %s721_s10 }
 0x11e   :  { %506 = vrot.lane.b32.xlu0 %v373_v39, %s721_s10 }
 0x11f   :  { %508 = vrot.lane.b32.xlu1 %v378_v35, %s721_s10 }
 0x154   :  { %v449_v40 = vpop.permute.xlu0 %448 }
 0x155   :  { %v481_v38 = vpop.permute.xlu1 %480  ;;  %544 = vst.msk [vmem:[%s1216_s4 + $0x8] sm:$0xff] %vm542_vm2, %v449_v40 }
 0x156   :  { %560 = vst.msk [vmem:[%s1216_s4 + $0x88] sm:$0xff] %vm542_vm2, %v481_v38 }
 0x158   :  { %v447_v42 = vpop.permute.xlu0 %446 }
 0x159   :  { %v453_v41 = vpop.permute.xlu1 %452  ;;  %543 = vst.msk [vmem:[%s1216_s4] sm:$0xff] %vm542_vm2, %v447_v42 }
 0x15a   :  { %546 = vst.msk [vmem:[%s1216_s4 + $0x18] sm:$0xff] %vm542_vm2, %v453_v41 }
 0x15c   :  { %v479_v44 = vpop.permute.xlu0 %478 }
 0x15d   :  { %v485_v43 = vpop.permute.xlu1 %484  ;;  %559 = vst.msk [vmem:[%s1216_s4 + $0x80] sm:$0xff] %vm542_vm2, %v479_v44 }
 0x15e   :  { %562 = vst.msk [vmem:[%s1216_s4 + $0x98] sm:$0xff] %vm542_vm2, %v485_v43 }
 0x160   :  { %v483_v46 = vpop.permute.xlu0 %482 }
 0x161   :  { %v451_v45 = vpop.permute.xlu1 %450  ;;  %561 = vst.msk [vmem:[%s1216_s4 + $0x90] sm:$0xff] %vm542_vm2, %v483_v46 }
 0x162   :  { %545 = vst.msk [vmem:[%s1216_s4 + $0x10] sm:$0xff] %vm542_vm2, %v451_v45 }
 0x164   :  { %v455_v48 = vpop.permute.xlu0 %454 }
 0x165   :  { %v457_v47 = vpop.permute.xlu1 %456  ;;  %547 = vst.msk [vmem:[%s1216_s4 + $0x20] sm:$0xff] %vm542_vm2, %v455_v48 }
 0x166   :  { %548 = vst.msk [vmem:[%s1216_s4 + $0x28] sm:$0xff] %vm542_vm2, %v457_v47 }
 0x168   :  { %v487_v50 = vpop.permute.xlu0 %486 }
 0x169   :  { %v489_v49 = vpop.permute.xlu1 %488  ;;  %563 = vst.msk [vmem:[%s1216_s4 + $0xa0] sm:$0xff] %vm542_vm2, %v487_v50 }
 0x16a   :  { %564 = vst.msk [vmem:[%s1216_s4 + $0xa8] sm:$0xff] %vm542_vm2, %v489_v49 }
 0x16c   :  { %v459_v52 = vpop.permute.xlu0 %458 }
 0x16d   :  { %v461_v51 = vpop.permute.xlu1 %460  ;;  %549 = vst.msk [vmem:[%s1216_s4 + $0x30] sm:$0xff] %vm542_vm2, %v459_v52 }
 0x16e   :  { %550 = vst.msk [vmem:[%s1216_s4 + $0x38] sm:$0xff] %vm542_vm2, %v461_v51 }
 0x170   :  { %v491_v54 = vpop.permute.xlu0 %490 }
 0x171   :  { %v493_v53 = vpop.permute.xlu1 %492  ;;  %565 = vst.msk [vmem:[%s1216_s4 + $0xb0] sm:$0xff] %vm542_vm2, %v491_v54 }
 0x172   :  { %566 = vst.msk [vmem:[%s1216_s4 + $0xb8] sm:$0xff] %vm542_vm2, %v493_v53 }
 0x174   :  { %v463_v56 = vpop.permute.xlu0 %462 }
 0x175   :  { %v465_v55 = vpop.permute.xlu1 %464  ;;  %551 = vst.msk [vmem:[%s1216_s4 + $0x40] sm:$0xff] %vm542_vm2, %v463_v56 }
 0x176   :  { %552 = vst.msk [vmem:[%s1216_s4 + $0x48] sm:$0xff] %vm542_vm2, %v465_v55 }
 0x178   :  { %v495_v58 = vpop.permute.xlu0 %494 }
 0x179   :  { %v497_v57 = vpop.permute.xlu1 %496  ;;  %567 = vst.msk [vmem:[%s1216_s4 + $0xc0] sm:$0xff] %vm542_vm2, %v495_v58 }
 0x17a   :  { %568 = vst.msk [vmem:[%s1216_s4 + $0xc8] sm:$0xff] %vm542_vm2, %v497_v57 }
 0x17c   :  { %v467_v60 = vpop.permute.xlu0 %466 }
 0x17d   :  { %v469_v59 = vpop.permute.xlu1 %468  ;;  %553 = vst.msk [vmem:[%s1216_s4 + $0x50] sm:$0xff] %vm542_vm2, %v467_v60 }
 0x17e   :  { %554 = vst.msk [vmem:[%s1216_s4 + $0x58] sm:$0xff] %vm542_vm2, %v469_v59 }
 0x180   :  { %v499_v62 = vpop.permute.xlu0 %498 }
 0x181   :  { %v501_v61 = vpop.permute.xlu1 %500  ;;  %569 = vst.msk [vmem:[%s1216_s4 + $0xd0] sm:$0xff] %vm542_vm2, %v499_v62 }
 0x182   :  { %570 = vst.msk [vmem:[%s1216_s4 + $0xd8] sm:$0xff] %vm542_vm2, %v501_v61 }
 0x184   :  { %v471_v0 = vpop.permute.xlu0 %470 }
 0x185   :  { %v473_v63 = vpop.permute.xlu1 %472  ;;  %555 = vst.msk [vmem:[%s1216_s4 + $0x60] sm:$0xff] %vm542_vm2, %v471_v0 }
 0x186   :  { %556 = vst.msk [vmem:[%s1216_s4 + $0x68] sm:$0xff] %vm542_vm2, %v473_v63 }
 0x188   :  { %v503_v2 = vpop.permute.xlu0 %502 }
 0x189   :  { %v505_v1 = vpop.permute.xlu1 %504  ;;  %571 = vst.msk [vmem:[%s1216_s4 + $0xe0] sm:$0xff] %vm542_vm2, %v503_v2 }
 0x18a   :  { %572 = vst.msk [vmem:[%s1216_s4 + $0xe8] sm:$0xff] %vm542_vm2, %v505_v1 }
 0x18c   :  { %v475_v4 = vpop.permute.xlu0 %474 }
 0x18d   :  { %v477_v3 = vpop.permute.xlu1 %476  ;;  %557 = vst.msk [vmem:[%s1216_s4 + $0x70] sm:$0xff] %vm542_vm2, %v475_v4 }
 0x18e   :  { %558 = vst.msk [vmem:[%s1216_s4 + $0x78] sm:$0xff] %vm542_vm2, %v477_v3 }
 0x190   :  { %v507_v6 = vpop.permute.xlu0 %506 }
 0x191   :  { %v509_v5 = vpop.permute.xlu1 %508  ;;  %573 = vst.msk [vmem:[%s1216_s4 + $0xf0] sm:$0xff] %vm542_vm2, %v507_v6 }
 0x192   :  { %574 = vst.msk [vmem:[%s1216_s4 + $0xf8] sm:$0xff] %vm542_vm2, %v509_v5 }

</bundles_post_ra>
